<compile_context>
chip_gen: v6e
topology: v6e:2x2x1
jax: 0.10.0
libtpu: 0.0.40
codegen_flags: <defaults>
</compile_context>

<pallas_src>
import functools

import jax
import jax.numpy as jnp
from jax.experimental import pallas as pl
from jax.experimental.pallas import tpu as pltpu


# ---------------------------------------------------------------------------
# Tiling / sizing heuristics
# ---------------------------------------------------------------------------
def _choose_row_tile(n, d, itemsize):
    """Rows per grid step: large enough to amortize the ~0.35us/step overhead,
    small enough that one (double-buffered) (tn, d) tile stays ~<= 8 MiB."""
    if itemsize >= 4:
        base, pack = 512, 8        # f32: 8-row sublane tile
    else:
        base, pack = 1024, 16      # bf16: 16-row packed sublane tile
    budget = 4 << 20               # bytes per single input buffer
    cap = max(pack, budget // max(1, d * itemsize))
    tn = max(pack, (min(base, cap) // pack) * pack)
    if tn >= n:
        return n                   # single row tile (full array dim is allowed)
    return tn


def _choose_col_tile(d):
    """Column-block width of the X^T X accumulator.  Blocks only when a full
    (d, d) f32 accumulator would be too big (v7x has 64 MiB physical VMEM)."""
    if d * d * 4 <= (16 << 20):
        return d
    if d % 128 != 0:
        # TODO(synk): mask trailing columns for huge non-128-multiple D.
        return d
    tc = ((8 << 20) // (4 * d)) // 128 * 128
    tc = max(128, min(tc, d))
    while d % tc != 0:
        tc -= 128
    return tc


def _vmem_limit_bytes(approx_bytes):
    """Per-generation scoped-VMEM sizing: only raise the limit when the real
    footprint needs it, and never above ~80% of the chip's physical VMEM."""
    try:
        info = pltpu.get_tpu_info()
        capacity = int(getattr(info, "vmem_capacity_bytes", 64 << 20))
    except Exception:
        capacity = 64 << 20        # conservative (v7x)
    if approx_bytes <= (12 << 20):
        return None                # default scoped limit covers it on all gens
    return int(min(approx_bytes * 1.5 + (4 << 20), capacity * 0.8))


# ---------------------------------------------------------------------------
# Kernel
# ---------------------------------------------------------------------------
def _make_inf_loss_kernel(n, d, tn, tc, nj, mask_rows, mxu_bf16, needs_s2m):
    """Streaming kernel.  Grid = (nj column blocks [outer], ni row tiles [inner]).

    Scratch: s1 (1,d), s2 (1,d), s2m (1,d), s1b (1,tc), C (d,tc), fro (SMEM)."""

    def kernel(*refs):
        if nj > 1:
            emb_ref, embc_ref = refs[0], refs[1]
            out_ref, s1_ref, s2_ref, s2m_ref, s1b_ref, c_ref, fro_ref = refs[2:]
        else:
            emb_ref, embc_ref = refs[0], None
            out_ref, s1_ref, s2_ref, s2m_ref, s1b_ref, c_ref, fro_ref = refs[1:]

        j = pl.program_id(0)            # column block (outer)
        i = pl.program_id(1)            # row tile    (inner)
        ni = pl.num_programs(1)
        nf = float(n)

        # ---- init ----------------------------------------------------------
        @pl.when(jnp.logical_and(j == 0, i == 0))
        def _():
            s1_ref[...] = jnp.zeros_like(s1_ref)
            s2_ref[...] = jnp.zeros_like(s2_ref)
            if needs_s2m:
                s2m_ref[...] = jnp.zeros_like(s2m_ref)
            fro_ref[0] = jnp.float32(0.0)

        @pl.when(i == 0)
        def _():
            c_ref[...] = jnp.zeros_like(c_ref)
            if nj > 1:
                s1b_ref[...] = jnp.zeros_like(s1b_ref)

        # ---- load row tile; statically-elided masking of the ragged tile ----
        x = emb_ref[...].astype(jnp.float32)                    # (tn, d)
        if mask_rows:
            rows = jax.lax.broadcasted_iota(jnp.int32, (tn, 1), 0) + i * tn
            x = jnp.where(rows < n, x, 0.0)

        # ---- one-pass moments, accumulated only on the first column sweep ---
        @pl.when(j == 0)
        def _():
            s1_ref[...] += jnp.sum(x, axis=0, keepdims=True)
            s2_ref[...] += jnp.sum(x * x, axis=0, keepdims=True)

        xm = x.astype(jnp.bfloat16) if mxu_bf16 else x          # MXU lhs operand
        if needs_s2m:
            xm32 = xm.astype(jnp.float32)

            @pl.when(j == 0)
            def _():
                # sums of squares of the *rounded* MXU operand values, so the
                # diagonal we subtract later matches the matmul's rounding path.
                s2m_ref[...] += jnp.sum(xm32 * xm32, axis=0, keepdims=True)

        if nj > 1:
            xr = embc_ref[...].astype(jnp.float32)              # (tn, tc)
            if mask_rows:
                xr = jnp.where(rows < n, xr, 0.0)
            s1b_ref[...] += jnp.sum(xr, axis=0, keepdims=True)
            rhs = xr.astype(jnp.bfloat16) if mxu_bf16 else xr
        else:
            rhs = xm

        # Partial X^T X (column block): contraction over the row axis.
        # TODO(synk): if profiling shows an XLU transpose inserted for this
        # non-canonical (0,0) contraction, pre-transpose / use pl.dot flags.
        c_ref[...] += jax.lax.dot_general(
            xm, rhs, dimension_numbers=(((0,), (0,)), ((), ())),
            preferred_element_type=jnp.float32)

        # ---- finalize this column block at the end of its row sweep ---------
        @pl.when(i == ni - 1)
        def _():
            inv_n = 1.0 / n
            mean = s1_ref[...] * inv_n                          # (1, d) f32

            @pl.when(j == 0)
            def _():
                # std_loss from the full-D one-pass moments (clamped variance).
                ssq = jnp.maximum(s2_ref[...] - nf * mean * mean, 0.0)
                std = jnp.sqrt(ssq * (1.0 / (n - 1)) + 1e-4)
                out_ref[0] = jnp.sum(jnp.maximum(1.0 - std, 0.0)) * (1.0 / d)
                # Subtract the diagonal's contribution to the Frobenius sum.
                s2d = s2m_ref[...] if needs_s2m else s2_ref[...]
                dvec = s2d - nf * mean * mean
                fro_ref[0] = fro_ref[0] - jnp.sum(dvec * dvec)

            # ||C_blk - n m m_blk^T||_F^2 without forming the outer product:
            #   sum(C^2) - 2n (m C).m_blk + n^2 (sum m^2)(sum m_blk^2)
            c = c_ref[...]                                      # (d, tc) f32
            mean_blk = (s1b_ref[...] * inv_n) if nj > 1 else mean
            v = jax.lax.dot_general(
                mean, c, dimension_numbers=(((1,), (0,)), ((), ())),
                preferred_element_type=jnp.float32)             # (1, tc)
            blk = (jnp.sum(c * c)
                   - 2.0 * nf * jnp.sum(v * mean_blk)
                   + (nf * nf) * jnp.sum(mean * mean) * jnp.sum(mean_blk * mean_blk))
            fro_ref[0] = fro_ref[0] + blk

            @pl.when(j == nj - 1)
            def _():
                inv_cov = 1.0 / (float(n - 1) * float(n - 1) * float(d))
                out_ref[1] = jnp.maximum(fro_ref[0], 0.0) * inv_cov

    return kernel


# ---------------------------------------------------------------------------
# Wrapper (pallas_call) + custom VJP
# ---------------------------------------------------------------------------
def _inf_loss_terms_impl(emb, bf16_matmul=False):
    n, d = emb.shape
    assert n >= 2, "INFLoss requires batch size >= 2 (unbiased variance)."

    itemsize = emb.dtype.itemsize
    input_is_bf16 = emb.dtype == jnp.bfloat16
    mxu_bf16 = bool(bf16_matmul) or input_is_bf16
    needs_s2m = bool(bf16_matmul) and not input_is_bf16

    tn = _choose_row_tile(n, d, itemsize)
    tc = _choose_col_tile(d)
    nj = d // tc
    ni = pl.cdiv(n, tn)
    mask_rows = (n % tn) != 0

    kernel = _make_inf_loss_kernel(n, d, tn, tc, nj, mask_rows, mxu_bf16,
                                   needs_s2m)

    in_specs = [pl.BlockSpec((tn, d), lambda j, i: (i, 0))]
    operands = [emb]
    if nj > 1:
        # Column-blocked view of the same array (rhs of the X^T X partials);
        # this avoids dynamic lane slicing and never builds a (d, d) buffer.
        in_specs.append(pl.BlockSpec((tn, tc), lambda j, i: (i, j)))
        operands.append(emb)

    scratch_shapes = [
        pltpu.VMEM((1, d), jnp.float32),      # s1: running sum(x)
        pltpu.VMEM((1, d), jnp.float32),      # s2: running sum(x^2)
        pltpu.VMEM((1, d), jnp.float32),      # s2m: sum of squared MXU operands
        pltpu.VMEM((1, tc), jnp.float32),     # s1b: per-column-block sum(x)
        pltpu.VMEM((d, tc), jnp.float32),     # C:  partial X^T X (column block)
        pltpu.SMEM((1,), jnp.float32),        # running Frobenius accumulator
    ]

    # Resident VMEM estimate: double-buffered input tiles (the grid exists now)
    # + moment vectors + the X^T X column-block accumulator.
    approx_bytes = (2 * tn * d * itemsize
                    + (2 * tn * tc * itemsize if nj > 1 else 0)
                    + 4 * (3 * d + tc)
                    + 4 * d * tc
                    + (1 << 16))
    compiler_params = pltpu.CompilerParams(
        dimension_semantics=("arbitrary", "arbitrary"),
        vmem_limit_bytes=_vmem_limit_bytes(approx_bytes))

    cost = pl.CostEstimate(
        flops=int(2 * n * d * d + 10 * n * d + 2 * d * d),
        transcendentals=int(d),
        bytes_accessed=int(n * d * itemsize * nj + 8))

    out = pl.pallas_call(
        kernel,
        out_shape=jax.ShapeDtypeStruct((2,), jnp.float32),
        grid=(nj, ni),
        in_specs=in_specs,
        out_specs=pl.BlockSpec(memory_space=pltpu.MemorySpace.SMEM),
        scratch_shapes=scratch_shapes,
        compiler_params=compiler_params,
        cost_estimate=cost,
    )(*operands)
    return out[0], out[1]


@functools.partial(jax.custom_vjp, nondiff_argnums=(1,))
def _inf_loss_terms(emb, bf16_matmul):
    return _inf_loss_terms_impl(emb, bf16_matmul)


def _inf_loss_terms_fwd(emb, bf16_matmul):
    return _inf_loss_terms_impl(emb, bf16_matmul), emb


def _inf_loss_terms_bwd(bf16_matmul, emb, cot):
    # Closed-form backward in plain JAX; both gradients have zero column mean,
    # so the centering projector drops out.
    g_std, g_cov = cot
    x = emb.astype(jnp.float32)
    n, d = x.shape
    xc = x - jnp.mean(x, axis=0, keepdims=True)
    var = jnp.sum(xc * xc, axis=0) / (n - 1)
    std = jnp.sqrt(var + 1e-4)
    d_std = xc * (jnp.where(std < 1.0, -1.0, 0.0) / (d * (n - 1) * std))[None, :]
    m = xc.T @ xc
    m_off = m - jnp.diag(jnp.diag(m))
    d_cov = (4.0 / (d * float(n - 1) ** 2)) * (xc @ m_off)
    g = g_std * d_std + g_cov * d_cov
    return (g.astype(emb.dtype),)


_inf_loss_terms.defvjp(_inf_loss_terms_fwd, _inf_loss_terms_bwd)


def inf_loss(emb, *, std_weight=25.0, covar_weight=1.0,
             use_mtl_weight=False, dataset_sigma_sqs=None, bf16_matmul=False):
    """Mirror of INFLoss.forward.  Scalar weighting is plain-JAX glue."""
    std_loss, cov_loss = _inf_loss_terms(emb, bool(bf16_matmul))
    if use_mtl_weight:
        sw = dataset_sigma_sqs[0]
        cw = dataset_sigma_sqs[1]
        return (std_loss / (2.0 * sw) + 0.5 * jnp.log(sw)
                + cov_loss / (2.0 * cw) + 0.5 * jnp.log(cw))
    return std_loss * std_weight + cov_loss * covar_weight


# ---------------------------------------------------------------------------
# Pure-JAX reference (literal transcription of the PyTorch module)
# ---------------------------------------------------------------------------
def _inf_loss_ref(emb, *, std_weight=25.0, covar_weight=1.0,
                  use_mtl_weight=False, dataset_sigma_sqs=None):
    emb = emb.astype(jnp.float32)
    n, d = emb.shape
    xc = emb - jnp.mean(emb, axis=0, keepdims=True)
    var = jnp.sum(xc * xc, axis=0) / (n - 1)
    std = jnp.sqrt(var + 1e-4)
    std_loss = jnp.mean(jnp.maximum(1.0 - std, 0.0))
    cov = xc.T @ xc / (n - 1)
    off = cov - jnp.diag(jnp.diag(cov))
    cov_loss = jnp.sum(off ** 2) / d
    if use_mtl_weight:
        sw, cw = dataset_sigma_sqs[0], dataset_sigma_sqs[1]
        return (std_loss / (2.0 * sw) + 0.5 * jnp.log(sw)
                + cov_loss / (2.0 * cw) + 0.5 * jnp.log(cw))
    return std_loss * std_weight + cov_loss * covar_weight


if __name__ == "__main__":
    key = jax.random.PRNGKey(0)
    k_emb, k_sigma, k_big, k_wide = jax.random.split(key, 4)

    # Small shapes consistent with the module: batch=8, features=32.
    N, D = 8, 32
    emb = jax.random.normal(k_emb, (N, D), dtype=jnp.float32)
    dataset_sigma_sqs = jax.random.uniform(
        k_sigma, (2,), jnp.float32, minval=0.2, maxval=1.0)

    # Fixed std/covar weighting.
    loss_fixed = jax.block_until_ready(
        inf_loss(emb, std_weight=25.0, covar_weight=1.0))
    ref_fixed = _inf_loss_ref(emb, std_weight=25.0, covar_weight=1.0)
    assert jnp.allclose(loss_fixed, ref_fixed, rtol=2e-4, atol=1e-5), \
        (loss_fixed, ref_fixed)

    # Learned uncertainty weighting.
    loss_mtl = jax.block_until_ready(
        inf_loss(emb, use_mtl_weight=True, dataset_sigma_sqs=dataset_sigma_sqs))
    ref_mtl = _inf_loss_ref(emb, use_mtl_weight=True,
                            dataset_sigma_sqs=dataset_sigma_sqs)
    assert jnp.allclose(loss_mtl, ref_mtl, rtol=2e-4, atol=1e-5), \
        (loss_mtl, ref_mtl)

    # Gradient through the Pallas forward (custom_vjp, closed-form backward).
    g = jax.block_until_ready(jax.grad(lambda e: inf_loss(e))(emb))
    g_ref = jax.grad(lambda e: _inf_loss_ref(e))(emb)
    assert jnp.allclose(g, g_ref, rtol=1e-3, atol=1e-5), (g, g_ref)

    # Streaming path: several row tiles + masked ragged last tile.
    emb_big = jax.random.normal(k_big, (1050, 256), dtype=jnp.float32)
    loss_big = jax.block_until_ready(inf_loss(emb_big))
    ref_big = _inf_loss_ref(emb_big)
    assert jnp.allclose(loss_big, ref_big, rtol=2e-4, atol=1e-5), \
        (loss_big, ref_big)

    # Column-blocked path (a full (D, D) f32 accumulator would be >16 MiB).
    emb_wide = jax.random.normal(k_wide, (64, 2304), dtype=jnp.float32)
    loss_wide = jax.block_until_ready(inf_loss(emb_wide))
    ref_wide = _inf_loss_ref(emb_wide)
    assert jnp.allclose(loss_wide, ref_wide, rtol=2e-4, atol=1e-4), \
        (loss_wide, ref_wide)

    # bf16 input and the optional bf16-MXU-for-f32-input flag (smoke tests).
    loss_bf16 = jax.block_until_ready(inf_loss(emb.astype(jnp.bfloat16)))
    assert jnp.isfinite(loss_bf16)
    assert abs(float(loss_bf16) - float(ref_fixed)) / abs(float(ref_fixed)) < 0.25
    loss_dc = jax.block_until_ready(inf_loss(emb, bf16_matmul=True))
    assert jnp.isfinite(loss_dc)
    assert abs(float(loss_dc) - float(ref_fixed)) / abs(float(ref_fixed)) < 0.25

    print("KERNEL_OK")
</pallas_src>

<mosaic_0001>
module attributes {stable_mosaic.version = 11 : i64} {
  func.func @kernel(%arg0: i32, %arg1: i32, %arg2: memref<8x32xf32, #tpu.memory_space<vmem>>, %arg3: memref<2xf32, #tpu.memory_space<smem>>, %arg4: memref<1x32xf32, #tpu.memory_space<vmem>>, %arg5: memref<1x32xf32, #tpu.memory_space<vmem>>, %arg6: memref<1x32xf32, #tpu.memory_space<vmem>>, %arg7: memref<1x32xf32, #tpu.memory_space<vmem>>, %arg8: memref<32x32xf32, #tpu.memory_space<vmem>>, %arg9: memref<1xf32, #tpu.memory_space<smem>>) attributes {dimension_semantics = [#tpu.dimension_semantics<arbitrary>, #tpu.dimension_semantics<arbitrary>], iteration_bounds = array<i64: 1, 1>, scalar_prefetch = 0 : i64, scratch_operands = 6 : i64, tpu.core_type = #tpu.core_type<tc>, window_params = [{transform_indices = @transform_0, window_bounds = array<i64: 8, 32>}, {transform_indices = @transform_1, window_bounds = array<i64: 2>}]} {
    %c0_i32 = arith.constant 0 : i32
    %0 = arith.cmpi eq, %arg0, %c0_i32 : i32
    %c0_i32_0 = arith.constant 0 : i32
    %1 = arith.cmpi eq, %arg1, %c0_i32_0 : i32
    %2 = arith.andi %0, %1 : i1
    %3 = arith.extui %2 : i1 to i32
    %c0_i32_1 = arith.constant 0 : i32
    %4 = arith.cmpi ne, %3, %c0_i32_1 : i32
    scf.if %4 {
      %cst_13 = arith.constant 0.000000e+00 : f32
      %19 = vector.broadcast %cst_13 : f32 to vector<1x32xf32>
      %c0_14 = arith.constant 0 : index
      %c0_15 = arith.constant 0 : index
      %20 = vector.load %arg4[%c0_14, %c0_15] : memref<1x32xf32, #tpu.memory_space<vmem>>, vector<1x32xf32>
      tpu.vector_store %arg4[%c0_14, %c0_15], %19 {strides = array<i32>} : memref<1x32xf32, #tpu.memory_space<vmem>>, vector<1x32xf32>,
      %cst_16 = arith.constant 0.000000e+00 : f32
      %21 = vector.broadcast %cst_16 : f32 to vector<1x32xf32>
      %c0_17 = arith.constant 0 : index
      %c0_18 = arith.constant 0 : index
      %22 = vector.load %arg5[%c0_17, %c0_18] : memref<1x32xf32, #tpu.memory_space<vmem>>, vector<1x32xf32>
      tpu.vector_store %arg5[%c0_17, %c0_18], %21 {strides = array<i32>} : memref<1x32xf32, #tpu.memory_space<vmem>>, vector<1x32xf32>,
      %cst_19 = arith.constant 0.000000e+00 : f32
      %c0_20 = arith.constant 0 : index
      %23 = memref.load %arg9[%c0_20] : memref<1xf32, #tpu.memory_space<smem>>
      memref.store %cst_19, %arg9[%c0_20] : memref<1xf32, #tpu.memory_space<smem>>
    } else {
    }
    %c0_i32_2 = arith.constant 0 : i32
    %5 = arith.cmpi eq, %arg1, %c0_i32_2 : i32
    %6 = arith.extui %5 : i1 to i32
    %c0_i32_3 = arith.constant 0 : i32
    %7 = arith.cmpi ne, %6, %c0_i32_3 : i32
    scf.if %7 {
      %cst_13 = arith.constant 0.000000e+00 : f32
      %19 = vector.broadcast %cst_13 : f32 to vector<32x32xf32>
      %c0_14 = arith.constant 0 : index
      %c0_15 = arith.constant 0 : index
      %20 = vector.load %arg8[%c0_14, %c0_15] : memref<32x32xf32, #tpu.memory_space<vmem>>, vector<32x32xf32>
      tpu.vector_store %arg8[%c0_14, %c0_15], %19 {strides = array<i32>} : memref<32x32xf32, #tpu.memory_space<vmem>>, vector<32x32xf32>,
    } else {
    }
    %c0 = arith.constant 0 : index
    %c0_4 = arith.constant 0 : index
    %8 = vector.load %arg2[%c0, %c0_4] : memref<8x32xf32, #tpu.memory_space<vmem>>, vector<8x32xf32>
    %c0_i32_5 = arith.constant 0 : i32
    %9 = arith.cmpi eq, %arg0, %c0_i32_5 : i32
    %10 = arith.extui %9 : i1 to i32
    %c0_i32_6 = arith.constant 0 : i32
    %11 = arith.cmpi ne, %10, %c0_i32_6 : i32
    scf.if %11 {
      %c0_13 = arith.constant 0 : index
      %c0_14 = arith.constant 0 : index
      %19 = vector.load %arg4[%c0_13, %c0_14] : memref<1x32xf32, #tpu.memory_space<vmem>>, vector<1x32xf32>
      %cst_15 = arith.constant dense<0.000000e+00> : vector<32xf32>
      %20 = vector.multi_reduction <add>, %8, %cst_15 [0] : vector<8x32xf32> to vector<32xf32>
      %21 = vector.shape_cast %20 : vector<32xf32> to vector<1x32xf32>
      %22 = arith.addf %19, %21 : vector<1x32xf32>
      %c0_16 = arith.constant 0 : index
      %c0_17 = arith.constant 0 : index
      %23 = vector.load %arg4[%c0_16, %c0_17] : memref<1x32xf32, #tpu.memory_space<vmem>>, vector<1x32xf32>
      tpu.vector_store %arg4[%c0_16, %c0_17], %22 {strides = array<i32>} : memref<1x32xf32, #tpu.memory_space<vmem>>, vector<1x32xf32>,
      %c0_18 = arith.constant 0 : index
      %c0_19 = arith.constant 0 : index
      %24 = vector.load %arg5[%c0_18, %c0_19] : memref<1x32xf32, #tpu.memory_space<vmem>>, vector<1x32xf32>
      %25 = arith.mulf %8, %8 : vector<8x32xf32>
      %cst_20 = arith.constant dense<0.000000e+00> : vector<32xf32>
      %26 = vector.multi_reduction <add>, %25, %cst_20 [0] : vector<8x32xf32> to vector<32xf32>
      %27 = vector.shape_cast %26 : vector<32xf32> to vector<1x32xf32>
      %28 = arith.addf %24, %27 : vector<1x32xf32>
      %c0_21 = arith.constant 0 : index
      %c0_22 = arith.constant 0 : index
      %29 = vector.load %arg5[%c0_21, %c0_22] : memref<1x32xf32, #tpu.memory_space<vmem>>, vector<1x32xf32>
      tpu.vector_store %arg5[%c0_21, %c0_22], %28 {strides = array<i32>} : memref<1x32xf32, #tpu.memory_space<vmem>>, vector<1x32xf32>,
    } else {
    }
    %c0_7 = arith.constant 0 : index
    %c0_8 = arith.constant 0 : index
    %12 = vector.load %arg8[%c0_7, %c0_8] : memref<32x32xf32, #tpu.memory_space<vmem>>, vector<32x32xf32>
    %cst = arith.constant dense<0.000000e+00> : vector<32x32xf32>
    %13 = tpu.matmul %8, %8, %cst {dimension_numbers = #tpu.dot_dimension_numbers<[0], [0], [1], [1], [0, 1, 1, 1], [], []>} : vector<8x32xf32>, vector<8x32xf32>, vector<32x32xf32> -> vector<32x32xf32>
    %14 = arith.addf %12, %13 : vector<32x32xf32>
    %c0_9 = arith.constant 0 : index
    %c0_10 = arith.constant 0 : index
    %15 = vector.load %arg8[%c0_9, %c0_10] : memref<32x32xf32, #tpu.memory_space<vmem>>, vector<32x32xf32>
    tpu.vector_store %arg8[%c0_9, %c0_10], %14 {strides = array<i32>} : memref<32x32xf32, #tpu.memory_space<vmem>>, vector<32x32xf32>,
    %c0_i32_11 = arith.constant 0 : i32
    %16 = arith.cmpi eq, %arg1, %c0_i32_11 : i32
    %17 = arith.extui %16 : i1 to i32
    %c0_i32_12 = arith.constant 0 : i32
    %18 = arith.cmpi ne, %17, %c0_i32_12 : i32
    scf.if %18 {
      %c0_13 = arith.constant 0 : index
      %c0_14 = arith.constant 0 : index
      %19 = vector.load %arg4[%c0_13, %c0_14] : memref<1x32xf32, #tpu.memory_space<vmem>>, vector<1x32xf32>
      %cst_15 = arith.constant 1.250000e-01 : f32
      %20 = vector.broadcast %cst_15 : f32 to vector<1x32xf32>
      %21 = arith.mulf %19, %20 : vector<1x32xf32>
      %c0_i32_16 = arith.constant 0 : i32
      %22 = arith.cmpi eq, %arg0, %c0_i32_16 : i32
      %23 = arith.extui %22 : i1 to i32
      %c0_i32_17 = arith.constant 0 : i32
      %24 = arith.cmpi ne, %23, %c0_i32_17 : i32
      scf.if %24 {
        %c0_31 = arith.constant 0 : index
        %c0_32 = arith.constant 0 : index
        %58 = vector.load %arg5[%c0_31, %c0_32] : memref<1x32xf32, #tpu.memory_space<vmem>>, vector<1x32xf32>
        %cst_33 = arith.constant 8.000000e+00 : f32
        %59 = vector.broadcast %cst_33 : f32 to vector<1x32xf32>
        %60 = arith.mulf %59, %21 : vector<1x32xf32>
        %61 = arith.mulf %60, %21 : vector<1x32xf32>
        %62 = arith.subf %58, %61 : vector<1x32xf32>
        %cst_34 = arith.constant 0.000000e+00 : f32
        %63 = vector.broadcast %cst_34 : f32 to vector<1x32xf32>
        %64 = arith.maximumf %62, %63 : vector<1x32xf32>
        %cst_35 = arith.constant 0.142857149 : f32
        %65 = vector.broadcast %cst_35 : f32 to vector<1x32xf32>
        %66 = arith.mulf %64, %65 : vector<1x32xf32>
        %cst_36 = arith.constant 9.99999974E-5 : f32
        %67 = vector.broadcast %cst_36 : f32 to vector<1x32xf32>
        %68 = arith.addf %66, %67 : vector<1x32xf32>
        %69 = math.sqrt %68 : vector<1x32xf32>
        %cst_37 = arith.constant 1.000000e+00 : f32
        %70 = vector.broadcast %cst_37 : f32 to vector<1x32xf32>
        %71 = arith.subf %70, %69 : vector<1x32xf32>
        %cst_38 = arith.constant 0.000000e+00 : f32
        %72 = vector.broadcast %cst_38 : f32 to vector<1x32xf32>
        %73 = arith.maximumf %71, %72 : vector<1x32xf32>
        %74 = vector.shape_cast %73 : vector<1x32xf32> to vector<1x1x32xf32>
        %cst_39 = arith.constant dense<0.000000e+00> : vector<1xf32>
        %75 = vector.multi_reduction <add>, %74, %cst_39 [1, 2] : vector<1x1x32xf32> to vector<1xf32>
        %76 = vector.shape_cast %75 : vector<1xf32> to vector<1x1x1xf32>
        %77 = vector.extract %76[0, 0, 0] : f32 from vector<1x1x1xf32>
        %cst_40 = arith.constant 3.125000e-02 : f32
        %78 = arith.mulf %77, %cst_40 : f32
        %c0_41 = arith.constant 0 : index
        %79 = memref.load %arg3[%c0_41] : memref<2xf32, #tpu.memory_space<smem>>
        memref.store %78, %arg3[%c0_41] : memref<2xf32, #tpu.memory_space<smem>>
        %c0_42 = arith.constant 0 : index
        %c0_43 = arith.constant 0 : index
        %80 = vector.load %arg5[%c0_42, %c0_43] : memref<1x32xf32, #tpu.memory_space<vmem>>, vector<1x32xf32>
        %cst_44 = arith.constant 8.000000e+00 : f32
        %81 = vector.broadcast %cst_44 : f32 to vector<1x32xf32>
        %82 = arith.mulf %81, %21 : vector<1x32xf32>
        %83 = arith.mulf %82, %21 : vector<1x32xf32>
        %84 = arith.subf %80, %83 : vector<1x32xf32>
        %c0_45 = arith.constant 0 : index
        %85 = memref.load %arg9[%c0_45] : memref<1xf32, #tpu.memory_space<smem>>
        %86 = arith.mulf %84, %84 : vector<1x32xf32>
        %87 = vector.shape_cast %86 : vector<1x32xf32> to vector<1x1x32xf32>
        %cst_46 = arith.constant dense<0.000000e+00> : vector<1xf32>
        %88 = vector.multi_reduction <add>, %87, %cst_46 [1, 2] : vector<1x1x32xf32> to vector<1xf32>
        %89 = vector.shape_cast %88 : vector<1xf32> to vector<1x1x1xf32>
        %90 = vector.extract %89[0, 0, 0] : f32 from vector<1x1x1xf32>
        %91 = arith.subf %85, %90 : f32
        %c0_47 = arith.constant 0 : index
        %92 = memref.load %arg9[%c0_47] : memref<1xf32, #tpu.memory_space<smem>>
        memref.store %91, %arg9[%c0_47] : memref<1xf32, #tpu.memory_space<smem>>
      } else {
      }
      %c0_18 = arith.constant 0 : index
      %c0_19 = arith.constant 0 : index
      %25 = vector.load %arg8[%c0_18, %c0_19] : memref<32x32xf32, #tpu.memory_space<vmem>>, vector<32x32xf32>
      %cst_20 = arith.constant dense<0.000000e+00> : vector<1x32xf32>
      %26 = tpu.matmul %21, %25, %cst_20 {dimension_numbers = #tpu.dot_dimension_numbers<[1], [0], [0], [1], [0, 0, 1, 1], [], []>} : vector<1x32xf32>, vector<32x32xf32>, vector<1x32xf32> -> vector<1x32xf32>
      %27 = arith.mulf %25, %25 : vector<32x32xf32>
      %28 = vector.shape_cast %27 : vector<32x32xf32> to vector<1x32x32xf32>
      %cst_21 = arith.constant dense<0.000000e+00> : vector<1xf32>
      %29 = vector.multi_reduction <add>, %28, %cst_21 [1, 2] : vector<1x32x32xf32> to vector<1xf32>
      %30 = vector.shape_cast %29 : vector<1xf32> to vector<1x1x1xf32>
      %31 = vector.extract %30[0, 0, 0] : f32 from vector<1x1x1xf32>
      %32 = arith.mulf %26, %21 : vector<1x32xf32>
      %33 = vector.shape_cast %32 : vector<1x32xf32> to vector<1x1x32xf32>
      %cst_22 = arith.constant dense<0.000000e+00> : vector<1xf32>
      %34 = vector.multi_reduction <add>, %33, %cst_22 [1, 2] : vector<1x1x32xf32> to vector<1xf32>
      %35 = vector.shape_cast %34 : vector<1xf32> to vector<1x1x1xf32>
      %36 = vector.extract %35[0, 0, 0] : f32 from vector<1x1x1xf32>
      %cst_23 = arith.constant 1.600000e+01 : f32
      %37 = arith.mulf %cst_23, %36 : f32
      %38 = arith.subf %31, %37 : f32
      %39 = arith.mulf %21, %21 : vector<1x32xf32>
      %40 = vector.shape_cast %39 : vector<1x32xf32> to vector<1x1x32xf32>
      %cst_24 = arith.constant dense<0.000000e+00> : vector<1xf32>
      %41 = vector.multi_reduction <add>, %40, %cst_24 [1, 2] : vector<1x1x32xf32> to vector<1xf32>
      %42 = vector.shape_cast %41 : vector<1xf32> to vector<1x1x1xf32>
      %43 = vector.extract %42[0, 0, 0] : f32 from vector<1x1x1xf32>
      %cst_25 = arith.constant 6.400000e+01 : f32
      %44 = arith.mulf %cst_25, %43 : f32
      %45 = arith.mulf %21, %21 : vector<1x32xf32>
      %46 = vector.shape_cast %45 : vector<1x32xf32> to vector<1x1x32xf32>
      %cst_26 = arith.constant dense<0.000000e+00> : vector<1xf32>
      %47 = vector.multi_reduction <add>, %46, %cst_26 [1, 2] : vector<1x1x32xf32> to vector<1xf32>
      %48 = vector.shape_cast %47 : vector<1xf32> to vector<1x1x1xf32>
      %49 = vector.extract %48[0, 0, 0] : f32 from vector<1x1x1xf32>
      %50 = arith.mulf %44, %49 : f32
      %51 = arith.addf %38, %50 : f32
      %c0_27 = arith.constant 0 : index
      %52 = memref.load %arg9[%c0_27] : memref<1xf32, #tpu.memory_space<smem>>
      %53 = arith.addf %52, %51 : f32
      %c0_28 = arith.constant 0 : index
      %54 = memref.load %arg9[%c0_28] : memref<1xf32, #tpu.memory_space<smem>>
      memref.store %53, %arg9[%c0_28] : memref<1xf32, #tpu.memory_space<smem>>
      %c0_i32_29 = arith.constant 0 : i32
      %55 = arith.cmpi eq, %arg0, %c0_i32_29 : i32
      %56 = arith.extui %55 : i1 to i32
      %c0_i32_30 = arith.constant 0 : i32
      %57 = arith.cmpi ne, %56, %c0_i32_30 : i32
      scf.if %57 {
        %c0_31 = arith.constant 0 : index
        %58 = memref.load %arg9[%c0_31] : memref<1xf32, #tpu.memory_space<smem>>
        %cst_32 = arith.constant 0.000000e+00 : f32
        %59 = arith.maximumf %58, %cst_32 : f32
        %cst_33 = arith.constant 6.37755089E-4 : f32
        %60 = arith.mulf %59, %cst_33 : f32
        %c1 = arith.constant 1 : index
        %61 = memref.load %arg3[%c1] : memref<2xf32, #tpu.memory_space<smem>>
        memref.store %60, %arg3[%c1] : memref<2xf32, #tpu.memory_space<smem>>
      } else {
      }
    } else {
    }
    return
  }
  func.func @transform_0(%arg0: i32, %arg1: i32) -> (i32, i32) {
    %c0_i32 = arith.constant 0 : i32
    %c0_i32_0 = arith.constant 0 : i32
    return %arg1, %c0_i32 : i32, i32
  }
  func.func @transform_1(%arg0: i32, %arg1: i32) -> i32 {
    %c0_i32 = arith.constant 0 : i32
    %c0_i32_0 = arith.constant 0 : i32
    return %c0_i32 : i32
  }
}

</mosaic_0001>

<bundles_post_ra>
// kernel: tpu_custom_call.1
= control target key start
LH: loop header
LB: loop body
LE: loop exit
PB: predicated region body
PF: predicated region fallthrough
CT: control target
= control target key end

     0   :  { %6 = vsyncpa [#allocation9], 0  ;;  %s562_s0 = inlined_call_operand.hbm [shape: f32[8,32], index: 0, kind: input, shape index: {}]   ;;  %s563_s1 = inlined_call_operand.hbm [shape: f32[2], index: 1, kind: output, shape index: {}]  }
   0x1   :  { %7 = vsyncpa [#allocation10], 0  ;;  %s499_s6 = smov [#allocation8]  }
   0x2   :  { %s14_s7 = sshll.u32 %s499_s6, 4  ;;  %s15_s7 = int_to_ptr.vmem [resolvable:$true] %s14_s7 }
   0x3   :  { %s475_s8 = scalar_lea.vmem %s15_s7, 128  ;;  %p480_p1 = scmp.lt.s32.totalorder %s15_s7, %s15_s7 }
   0x4   :  { %p476_p0 = scmp.ne.s32.totalorder %s15_s7, %s475_s8  ;;  %p481_p2 = scmp.lt.s32.totalorder %s475_s8, %s475_s8 }
   0x6   :  { %p482_p3 = por %p481_p2, %p480_p1 }
   0x8   :  { %p483_p4 = pnand %p482_p3, %p476_p0 }
   0xa   :  { %486 = shalt.err (!%p483_p4)
}
   0xb   :  { %17 = dma.hbm_to_vmem [thread:$0]  %s562_s0, 128, %s15_s7, [#allocation9]  }
   0xc   :  { %495 = dma.done.wait [#allocation9], 128  }
   0xd   :  { %496 = vsyncadd [#allocation9], 4294967168  ;;  %v40_v0 = vld [vmem:[#allocation8] sm:$0xff]  ;;  %vm35_vm0 = vcmask 261120   ;;  %v500_v1 = vmov 0.0   ;;  %vm103_vm1 = vcmask 64512  }
   0xe   :  { %71 = vxpose.xlu0.b32.start.end [1/1] (short) (narrow) %v40_v0, 32  ;;  %431 = vmatprep.subr.mxu0 %v40_v0  ;;  %37 = vst.msk [vmem:[#allocation6 + $0x8] sm:$0xff] %vm35_vm0, %v500_v1  ;;  %36 = vst.msk [vmem:[#allocation6] sm:$0xff] %vm35_vm0, %v500_v1  ;;  %v46_v6 = vsel %vm35_vm0, %v40_v0, 0.0  ;;  %v57_v7 = vmul.f32 %v40_v0, %v40_v0  ;;  %vm27_vm2 = vcmask 253952   ;;  %vm501_vm5 = vmmov 0  }
   0xf   :  { %432 = vmatpush3.msra.mxu0 %v40_v0  ;;  %38 = vst.msk [vmem:[#allocation6 + $0x10] sm:$0xff] %vm35_vm0, %v500_v1  ;;  %39 = vst.msk [vmem:[#allocation6 + $0x18] sm:$0xff] %vm35_vm0, %v500_v1  ;;  %439 = vmatprep.subr.mxu1 %v500_v1  ;;  %v47_v8 = vrot.slane %v46_v6, 4  ;;  %s502_s23 = smov 0.0   ;;  %s503_s26 = smov [#allocation11]  }
  0x10   :  { %v58_v9 = vsel %vm35_vm0, %v57_v7, 0.0  ;;  %28 = vst.msk [vmem:[#allocation2] sm:$0x1] %vm27_vm2, %v500_v1  ;;  %29 = vst.msk [vmem:[#allocation3] sm:$0x1] %vm27_vm2, %v500_v1  ;;  %447 = vmatprep.mubr.msk.f32.mxu1 %vm501_vm5, %v500_v1 }
  0x11   :  { %v48_v10 = vadd.f32 %v47_v8, %v46_v6  ;;  %v59_v11 = vrot.slane %v58_v9, 4 }
  0x13   :  { %v49_v12 = vrot.slane %v48_v10, 2  ;;  %v60_v13 = vadd.f32 %v59_v11, %v58_v9 }
  0x15   :  { %v50_v14 = vadd.f32 %v49_v12, %v48_v10  ;;  %v61_v15 = vrot.slane %v60_v13, 2  ;;  %v68_v46 = vld [vmem:[#allocation6 + $0x8] sm:$0xff]  ;;  %v67_v48 = vld [vmem:[#allocation6] sm:$0xff] }
  0x16   :  { %v70_v52 = vld [vmem:[#allocation6 + $0x18] sm:$0xff]  ;;  %v69_v54 = vld [vmem:[#allocation6 + $0x10] sm:$0xff] }
  0x17   :  { %v51_v16 = vrot.slane %v50_v14, 1  ;;  %v62_v17 = vadd.f32 %v61_v15, %v60_v13  ;;  %v44_v20 = vld [vmem:[#allocation2] sm:$0x1]  ;;  %v56_v23 = vld [vmem:[#allocation3] sm:$0x1] }
  0x19   :  { %v52_v18 = vadd.f32 %v51_v16, %v50_v14  ;;  %v63_v19 = vrot.slane %v62_v17, 1 }
  0x1b   :  { %v53_v21 = vadd.f32 %v52_v18, %v44_v20  ;;  %v64_v22 = vadd.f32 %v63_v19, %v62_v17 }
  0x1d   :  { %55 = vst.msk [vmem:[#allocation2] sm:$0x1] %vm27_vm2, %v53_v21  ;;  %v65_v24 = vadd.f32 %v64_v22, %v56_v23 }
  0x1f   :  { %66 = vst.msk [vmem:[#allocation3] sm:$0x1] %vm27_vm2, %v65_v24 }
  0x24   :  { %v213_v25 = vld [vmem:[#allocation2] sm:$0x1] }
  0x25   :  { %v534_v26 = vmul.f32 0.125, %v213_v25 }
  0x26   :  { %v218_v29 = vld [vmem:[#allocation3] sm:$0x1] }
  0x27   :  { %v219_v27 = vmul.f32 8.0, %v534_v26  ;;  %v248_v35 = vld [vmem:[#allocation3] sm:$0x1] }
  0x29   :  { %v220_v28 = vmul.f32 %v219_v27, %v534_v26 }
  0x2b   :  { %v221_v30 = vsub.f32 %v218_v29, %v220_v28  ;;  %v249_v36 = vsub.f32 %v248_v35, %v220_v28 }
  0x2d   :  { %v222_v31 = vmax.f32 %v221_v30, 0.0  ;;  %v251_v39 = vmul.f32 %v249_v36, %v249_v36 }
  0x2f   :  { %v223_v32 = vmul.f32 0.14285715, %v222_v31  ;;  %v252_v42 = vsel %vm27_vm2, %v251_v39, 0.0 }
  0x30   :  { %253 = vadd.xlane.f32.xlu1 %v252_v42 }
  0x31   :  { %v224_v33 = vadd.f32 0.0001, %v223_v32 }
  0x33   :  { %465 = vrsqrt.f32 %v224_v33  ;;  %vm227_vm3 = vcmp.eq.f32.partialorder %v224_v33, inf  ;;  %v230_v38 = vand.u32 2147483648, %v224_v33  ;;  %vm229_vm4 = vcmp.eq.f32.partialorder %v224_v33, 0.0 }
  0x40   :  { %v466_v34 = vpop.eup %465 }
  0x41   :  { %v226_v37 = vmul.f32 %v466_v34, %v224_v33 }
  0x43   :  { %v228_v40 = vsel %vm227_vm3, %v224_v33, %v226_v37  ;;  %v376_v33 = vmul.f32 %v534_v26, %v534_v26 }
  0x44   :  { %v231_v41 = vsel %vm229_vm4, %v230_v38, %v228_v40 }
  0x45   :  { %v232_v43 = vsub.f32 1.0, %v231_v41  ;;  %v377_v36 = vsel %vm27_vm2, %v376_v33, 0.0 }
  0x47   :  { %v233_v44 = vmax.f32 %v232_v43, 0.0 }
  0x49   :  { %v235_v45 = vsel %vm27_vm2, %v233_v44, 0.0 }
  0x4a   :  { %236 = vadd.xlane.f32.xlu0 %v235_v45 }
  0x8a   :  { %v87_v2 = vpop.trf.xlu0 }
  0x8b   :  { %433 = vmatprep.mubr.msk.f32.mxu0 %vm103_vm1, %v87_v2 }
  0x8e   :  { %v88_v3 = vpop.trf.xlu0 }
  0x8f   :  { %434 = vmatmul.mubr.msk.f32.vlgmr.msra.gmra.mxu0 %vm103_vm1, %v88_v3 }
  0x92   :  { %v89_v4 = vpop.trf.xlu0 }
  0x93   :  { %436 = vmatprep.mubr.msk.f32.mxu0 %vm103_vm1, %v89_v4 }
  0x96   :  { %v90_v5 = vpop.trf.xlu0 }
  0x97   :  { %437 = vmatmul.mubr.msk.f32.gmra.mxu0 %vm103_vm1, %v90_v5 }
  0xb9   :  { %v254_v10 = vpop.xlane.xlu1 %253 }
  0xba   :  { %v255_v11 = vrot.slane %v254_v10, 4 }
  0xbc   :  { %v256_v12 = vadd.f32 %v255_v11, %v254_v10 }
  0xbe   :  { %v257_v14 = vrot.slane %v256_v12, 2 }
  0xc0   :  { %v258_v18 = vadd.f32 %v257_v14, %v256_v12 }
  0xd3   :  { %v237_v13 = vpop.xlane.xlu0 %236 }
  0xd4   :  { %v238_v15 = vrot.slane %v237_v13, 4 }
  0xd6   :  { %v239_v16 = vadd.f32 %v238_v15, %v237_v13 }
  0xd8   :  { %v240_v17 = vrot.slane %v239_v16, 2 }
  0xda   :  { %v241_v19 = vadd.f32 %v240_v17, %v239_v16 }
  0xdc   :  { %v242_v20 = vrot.slane %v241_v19, 1 }
  0xde   :  { %v243_v22 = vadd.f32 %v242_v20, %v241_v19 }
  0xe0   :  { %450 = vpush %v243_v22 }
 0x111   :  { %s451_s0 = spop %450 }
 0x112   :  { %s245_s11 = smul.f32 0.03125, %s451_s0 }
 0x114   :  { %247 = sst [smem:[#allocation11]] %s245_s11 }
 0x14f   :  { %v435_v47 = vpop.f32.mrf.mxu0 }
 0x150   :  { %v202_v49 = vadd.f32 %v435_v47, %v68_v46 }
 0x151   :  { %v182_v50 = vpop.f32.mrf.mxu0 }
 0x152   :  { %207 = vst.msk [vmem:[#allocation6 + $0x8] sm:$0xff] %vm35_vm0, %v202_v49  ;;  %v201_v51 = vadd.f32 %v182_v50, %v67_v48 }
 0x154   :  { %206 = vst.msk [vmem:[#allocation6] sm:$0xff] %vm35_vm0, %v201_v51 }
 0x157   :  { %v438_v53 = vpop.f32.mrf.mxu0 }
 0x158   :  { %v204_v55 = vadd.f32 %v438_v53, %v70_v52 }
 0x159   :  { %v192_v56 = vpop.f32.mrf.mxu0  ;;  %v266_v59 = vld [vmem:[#allocation6 + $0x8] sm:$0xff] }
 0x15a   :  { %209 = vst.msk [vmem:[#allocation6 + $0x18] sm:$0xff] %vm35_vm0, %v204_v55  ;;  %v203_v57 = vadd.f32 %v192_v56, %v69_v54  ;;  %v343_v61 = vmul.f32 %v266_v59, %v266_v59 }
 0x15b   :  { %v265_v58 = vld [vmem:[#allocation6] sm:$0xff] }
 0x15c   :  { %208 = vst.msk [vmem:[#allocation6 + $0x10] sm:$0xff] %vm35_vm0, %v203_v57  ;;  %v342_v60 = vmul.f32 %v265_v58, %v265_v58  ;;  %v347_v4 = vsel %vm35_vm0, %v343_v61, 0.0 }
 0x15e   :  { %v346_v63 = vsel %vm35_vm0, %v342_v60, 0.0 }
 0x15f   :  { %v348_v5 = vadd.f32 %v347_v4, %v346_v63 }
 0x161   :  { %v268_v62 = vld [vmem:[#allocation6 + $0x18] sm:$0xff] }
 0x162   :  { %440 = vmatpush3.msra.mxu1 %v268_v62  ;;  %v345_v2 = vmul.f32 %v268_v62, %v268_v62 }
 0x163   :  { %441 = vmatprep.subr.mxu1 %v500_v1  ;;  %v267_v0 = vld [vmem:[#allocation6 + $0x10] sm:$0xff] }
 0x164   :  { %442 = vmatpush3.msra.mxu1 %v267_v0  ;;  %v344_v3 = vmul.f32 %v267_v0, %v267_v0  ;;  %v351_v8 = vsel %vm35_vm0, %v345_v2, 0.0 }
 0x165   :  { %443 = vmatprep.subr.mxu1 %v500_v1 }
 0x166   :  { %444 = vmatpush3.msra.mxu1 %v266_v59  ;;  %v349_v6 = vsel %vm35_vm0, %v344_v3, 0.0 }
 0x167   :  { %445 = vmatprep.subr.mxu1 %v500_v1  ;;  %v350_v7 = vadd.f32 %v349_v6, %v348_v5  ;;  %v259_v1 = vrot.slane %v258_v18, 1 }
 0x168   :  { %446 = vmatpush3.msra.mxu1 %v265_v58 }
 0x169   :  { %448 = vmatmul.mubr.msk.f32.vlgmr.msra.gmra.mxu1 %vm35_vm0, %v534_v26  ;;  %v352_v9 = vadd.f32 %v351_v8, %v350_v7  ;;  %v260_v21 = vadd.f32 %v259_v1, %v258_v18 }
 0x16b   :  { %353 = vadd.xlane.f32.xlu1 %v352_v9  ;;  %452 = vpush %v260_v21 }
 0x19c   :  { %s453_s12 = spop %452 }
 0x19d   :  { %s262_s20 = ssub.f32 0.0, %s453_s12 }
 0x1f4   :  { %v354_v23 = vpop.xlane.xlu1 %353 }
 0x1f5   :  { %v355_v24 = vrot.slane %v354_v23, 4 }
 0x1f7   :  { %v356_v25 = vadd.f32 %v355_v24, %v354_v23 }
 0x1f9   :  { %v357_v27 = vrot.slane %v356_v25, 2 }
 0x1fb   :  { %v358_v28 = vadd.f32 %v357_v27, %v356_v25 }
 0x1fd   :  { %v359_v29 = vrot.slane %v358_v28, 1 }
 0x1ff   :  { %v360_v30 = vadd.f32 %v359_v29, %v358_v28 }
 0x201   :  { %454 = vpush %v360_v30 }
 0x229   :  { %v338_v31 = vpop.f32.mrf.mxu1 }
 0x22a   :  { %v362_v32 = vmul.f32 %v338_v31, %v534_v26 }
 0x22b   :  { %v449_v34 = vpop.f32.mrf.mxu1 }
 0x22c   :  { %v364_v35 = vsel %vm27_vm2, %v362_v32, 0.0 }
 0x22d   :  { %365 = vadd.xlane.f32.xlu1 %v364_v35 }
 0x231   :  { %378 = vadd.xlane.f32.xlu1 %v377_v36 }
 0x232   :  { %s455_s13 = spop %454 }
 0x2b6   :  { %v366_v37 = vpop.xlane.xlu1 %365 }
 0x2b7   :  { %v367_v38 = vrot.slane %v366_v37, 4 }
 0x2b9   :  { %v368_v39 = vadd.f32 %v367_v38, %v366_v37 }
 0x2ba   :  { %v379_v40 = vpop.xlane.xlu1 %378 }
 0x2bb   :  { %v369_v41 = vrot.slane %v368_v39, 2  ;;  %v380_v42 = vrot.slane %v379_v40, 4 }
 0x2bd   :  { %v381_v43 = vadd.f32 %v380_v42, %v379_v40  ;;  %v370_v44 = vadd.f32 %v369_v41, %v368_v39 }
 0x2bf   :  { %v382_v45 = vrot.slane %v381_v43, 2  ;;  %v371_v46 = vrot.slane %v370_v44, 1 }
 0x2c1   :  { %v383_v47 = vadd.f32 %v382_v45, %v381_v43  ;;  %v372_v48 = vadd.f32 %v371_v46, %v370_v44 }
 0x2c3   :  { %456 = vpush %v372_v48  ;;  %v384_v26 = vrot.slane %v383_v47, 1 }
 0x2c5   :  { %v385_v49 = vadd.f32 %v384_v26, %v383_v47 }
 0x2c7   :  { %458 = vpush %v385_v49 }
 0x2f4   :  { %s457_s14 = spop %456 }
 0x2f5   :  { %s374_s15 = smul.f32 16.0, %s457_s14 }
 0x2f7   :  { %s375_s18 = ssub.f32 %s455_s13, %s374_s15 }
 0x2f8   :  { %s459_s16 = spop %458 }
 0x2f9   :  { %s387_s17 = smul.f32 64.0, %s459_s16 }
 0x2fb   :  { %s388_s19 = smul.f32 %s459_s16, %s387_s17 }
 0x2fd   :  { %s389_s21 = sadd.f32 %s388_s19, %s375_s18 }
 0x2ff   :  { %s391_s22 = sadd.f32 %s389_s21, %s262_s20 }
 0x301   :  { %s398_s24 = smax.f32 %s502_s23, %s391_s22 }
 0x302   :  { %s399_s25 = smul.f32 0.0006377551, %s398_s24 }
 0x304   :  { %401 = sst [smem:[#allocation11 + $0x1]] %s399_s25 }
 0x305   :  { %409 = dma.smem_to_hbm %s503_s26, 16, %s563_s1, [#allocation10]  }
 0x306   :  { %497 = dma.done.wait [#allocation10], 16  }
 0x307   :  { %498 = vsyncadd [#allocation10], 4294967280 }
 0x308   :  { %413 = sfence }
 0x309   :  { %414 = vsyncpa [#allocation9], 1 }
 0x30a   :  { %415 = vsyncpa [#allocation10], 1 }

</bundles_post_ra>
